<compile_context>
chip_gen: v7x
topology: tpu7x:2x2x1
jax: 0.10.0
libtpu: 0.0.40
codegen_flags: <defaults>
</compile_context>

<pallas_src>
import functools

import numpy as np

import jax
import jax.numpy as jnp
from jax.experimental import pallas as pl
from jax.experimental.pallas import tpu as pltpu

# ---------------------------------------------------------------------------
# Synthetic-CLIP hyperparameters (small shapes)
# ---------------------------------------------------------------------------
PATCH = 8          # ViT patch size (real CLIP: 32)
IMG_SIZE = 16      # encoder input spatial size (real CLIP: 224)
CHANNELS = 3
WIDTH = 32         # transformer width (real CLIP: 768)
EMBED = 16         # joint embedding dim (real CLIP: 512)
VOCAB = 64
TXT_LEN = 8
UP_SCALE = 7           # torch.nn.Upsample(scale_factor=7), mode='nearest'
POOL_K = 1024 // 32    # torch.nn.AvgPool2d(kernel_size=32)
LOGIT_SCALE = 1.0 / 0.07


def _round_up(x, m):
    return ((x + m - 1) // m) * m


# ---------------------------------------------------------------------------
# Host-side (init / per-shape, cached) fold helpers — plain numpy, run once.
# ---------------------------------------------------------------------------
def _np_patch_mean_matrix(h_in):
    # S[p, h] = 1/(h_in//PATCH) iff h % PATCH == p.
    # S @ x averages, for each within-patch offset p, over all patch positions.
    n = h_in // PATCH
    s = np.zeros((PATCH, h_in), np.float32)
    s[np.arange(h_in) % PATCH, np.arange(h_in)] = 1.0 / n
    return s


def _np_upsample_avgpool_matrix(h_in):
    # nearest Upsample(x7) then AvgPool2d(32) with ceil_mode=False -> (h_out, h_in).
    # Trailing rows/cols of the upsampled image are dropped (floor), matching torch.
    h_up = h_in * UP_SCALE
    h_out = h_up // POOL_K
    a = np.zeros((h_out, h_in), np.float32)
    k = np.arange(h_out * POOL_K)
    np.add.at(a, (k // POOL_K, k // UP_SCALE), 1.0 / POOL_K)
    return a


# ---------------------------------------------------------------------------
# The single fused Pallas kernel: image matmul + text gather + CLIP head.
# ---------------------------------------------------------------------------
def _clip_forward_kernel(img_ref, w_img_ref, b_img_ref, tok_ref, vocab_ref,
                         out_ref, *, scale, seq_len, n_img, n_txt):
    # ---- image tower --------------------------------------------------------
    # w_img_ref: (E, K) bf16 (K dense on lanes), img_ref: (B, K) bf16.
    # Contract K (lane dim of both) with the *image* as the RHS so the operand
    # that gets relayouted for the MXU is the 2-row image, not the 16-row
    # weight (roughly halves the XLU transpose work).
    img_feat_t = jax.lax.dot_general(
        w_img_ref[...], img_ref[...],
        dimension_numbers=(((1,), (1,)), ((), ())),
        preferred_element_type=jnp.float32)                 # (E, B) f32
    img_feat = img_feat_t.T + b_img_ref[...]                # (B, E); 1-granule vxpose

    # ---- text tower ---------------------------------------------------------
    # Token ids are scalars in SMEM; gather rows of the pre-projected vocab
    # table with dynamic sublane slices and average over the sequence.
    emb = vocab_ref.shape[1]
    txt_rows = []
    for j in range(n_txt):
        acc = vocab_ref[pl.ds(tok_ref[j * seq_len], 1), :]
        for l in range(1, seq_len):
            acc = acc + vocab_ref[pl.ds(tok_ref[j * seq_len + l], 1), :]
        txt_rows.append(acc)
    txt_feat = jnp.concatenate(txt_rows, axis=0) * (1.0 / seq_len)     # (Bt, E)

    # ---- CLIP head ----------------------------------------------------------
    # L2 normalize (+eps; torch F.normalize clamps the norm, so exactly-zero
    # features give 0 here instead of NaN).  logit_scale/100 folded into txt_n.
    img_n = img_feat * jax.lax.rsqrt(
        jnp.sum(img_feat * img_feat, axis=-1, keepdims=True) + 1e-12)
    txt_n = txt_feat * jax.lax.rsqrt(
        jnp.sum(txt_feat * txt_feat, axis=-1, keepdims=True) + 1e-12)
    txt_n = txt_n * scale                                   # scale = logit_scale / 100

    # Pad the small (., E) feature matrices along sublanes so the head matmul
    # emits the full (8, 128) output tile directly -> one unmasked store.
    rows, cols = out_ref.shape
    if rows > n_img:
        img_n = jnp.concatenate(
            [img_n, jnp.zeros((rows - n_img, emb), jnp.float32)], axis=0)
    if cols > n_txt:
        txt_n = jnp.concatenate(
            [txt_n, jnp.zeros((cols - n_txt, emb), jnp.float32)], axis=0)
    raw = jax.lax.dot_general(
        img_n, txt_n, dimension_numbers=(((1,), (1,)), ((), ())),
        preferred_element_type=jnp.float32)                 # (8, 128)
    out_ref[...] = 1.0 - raw                                # padded entries -> 1


# ---------------------------------------------------------------------------
# Grid-less pallas_call wrapper (whole arrays in VMEM, token ids in SMEM).
# ---------------------------------------------------------------------------
@functools.partial(jax.jit, static_argnames=("logit_scale",))
def _clip_forward(image, w_img_ek, b_img, text, vocab_proj, *, logit_scale):
    n_img = image.shape[0]
    k = image.shape[1] * image.shape[2] * image.shape[3]
    n_txt, seq_len = text.shape
    img_flat = image.reshape(n_img, k).astype(jnp.bfloat16)   # free reshape + cheap cast
    tok = text.astype(jnp.int32).reshape(n_txt * seq_len)     # -> SMEM scalars
    out_rows = _round_up(n_img, 8)
    out_cols = _round_up(n_txt, 128)
    kernel = functools.partial(
        _clip_forward_kernel, scale=logit_scale / 100.0,
        seq_len=seq_len, n_img=n_img, n_txt=n_txt)
    vmem = pltpu.MemorySpace.VMEM
    smem = pltpu.MemorySpace.SMEM
    padded = pl.pallas_call(
        kernel,
        out_shape=jax.ShapeDtypeStruct((out_rows, out_cols), jnp.float32),
        in_specs=[pl.BlockSpec(memory_space=vmem),    # flattened image (B, K) bf16
                  pl.BlockSpec(memory_space=vmem),    # folded weight  (E, K) bf16
                  pl.BlockSpec(memory_space=vmem),    # bias           (1, E) f32
                  pl.BlockSpec(memory_space=smem),    # token ids      (Bt*L,) i32
                  pl.BlockSpec(memory_space=vmem)],   # vocab_proj     (V, E) f32
        out_specs=pl.BlockSpec(memory_space=vmem),
    )(img_flat, w_img_ek, b_img, tok, vocab_proj)
    return padded[:n_img, :n_txt]


# ---------------------------------------------------------------------------
# Module wrapper
# ---------------------------------------------------------------------------
class CLIPLossPallas:
    def __init__(self, key):
        k0, k1, k2, k3 = jax.random.split(key, 4)
        pdim = CHANNELS * PATCH * PATCH
        # Raw synthetic weights (kept for the pure-JAX f32 reference).
        self.w_patch = 0.02 * jax.random.normal(k0, (pdim, WIDTH), jnp.float32)
        self.b_patch = jnp.zeros((1, WIDTH), jnp.float32)
        self.w_img_proj = 0.05 * jax.random.normal(k1, (WIDTH, EMBED), jnp.float32)
        self.token_emb = 0.02 * jax.random.normal(k2, (VOCAB, WIDTH), jnp.float32)
        self.w_txt_proj = 0.05 * jax.random.normal(k3, (WIDTH, EMBED), jnp.float32)
        self.logit_scale = LOGIT_SCALE

        # ---- init-time algebraic folds --------------------------------------
        # patch-embed -> mean-over-patches -> projection collapses to one weight
        self._w_patch_fused = np.asarray(self.w_patch @ self.w_img_proj)   # (192, E)
        self.b_img_fused = self.b_patch @ self.w_img_proj                  # (1, E) f32
        # token embedding pre-projected into the joint space (f32, tiny)
        self.vocab_proj = self.token_emb @ self.w_txt_proj                 # (V, E)
        # per-input-spatial-shape folded image weights (E, C*H*W) bf16
        self._fold_cache = {}

    # --- fold the full (linear) image tower into one (E, C*H*W) weight -------
    def _image_weight(self, h, w, use_avg_pool):
        key = (h, w, bool(use_avg_pool))
        cached = self._fold_cache.get(key)
        if cached is not None:
            return cached
        if use_avg_pool:
            ah = _np_upsample_avgpool_matrix(h)                 # (Hp, h)
            aw = _np_upsample_avgpool_matrix(w)                 # (Wp, w)
            hp, wp = ah.shape[0], aw.shape[0]
            assert hp % PATCH == 0 and wp % PATCH == 0, "pooled size must tile"
            rh = _np_patch_mean_matrix(hp) @ ah                 # (P, h)
            rw = _np_patch_mean_matrix(wp) @ aw                 # (P, w)
        else:
            assert h % PATCH == 0 and w % PATCH == 0, "image must tile into patches"
            rh = _np_patch_mean_matrix(h)                       # (P, h)
            rw = _np_patch_mean_matrix(w)                       # (P, w)
        wf = self._w_patch_fused.reshape(CHANNELS, PATCH, PATCH, EMBED)
        # QT[e, c*h*w + y*w + x] = sum_{p,q} rh[p,y] * rw[q,x] * wf[c,p,q,e]
        qt = np.einsum("ph,qw,cpqe->echw", rh, rw, wf)
        qt = qt.reshape(EMBED, CHANNELS * h * w)
        # bf16: halves the dominant weight DMA; it only ever feeds the MXU
        # (f32 accumulation), so it is safe on v5e/v6e/v7x alike.
        qt = jnp.asarray(qt, dtype=jnp.bfloat16)
        self._fold_cache[key] = qt
        return qt

    def __call__(self, image, text, use_avg_pool=False):
        b, c, h, w = image.shape
        if c != CHANNELS:
            raise ValueError(f"expected {CHANNELS} channels, got {c}")
        w_img_ek = self._image_weight(h, w, use_avg_pool)
        return _clip_forward(image, w_img_ek, self.b_img_fused, text,
                             self.vocab_proj, logit_scale=self.logit_scale)

    # --- pure-JAX reference (un-fused, un-folded, f32) for correctness checks -
    def reference_forward(self, image, text, use_avg_pool=False):
        x = image
        if use_avg_pool:
            x = jnp.repeat(jnp.repeat(x, UP_SCALE, axis=2), UP_SCALE, axis=3)
            hh = (x.shape[2] // POOL_K) * POOL_K
            ww = (x.shape[3] // POOL_K) * POOL_K
            x = x[:, :, :hh, :ww]
            b_, c_, _, _ = x.shape
            x = x.reshape(b_, c_, hh // POOL_K, POOL_K,
                          ww // POOL_K, POOL_K).mean(axis=(3, 5))
        b, c, h, w = x.shape
        nph, npw = h // PATCH, w // PATCH
        p = x.reshape(b, c, nph, PATCH, npw, PATCH).transpose(0, 2, 4, 1, 3, 5)
        patches = p.reshape(b, nph * npw, c * PATCH * PATCH)
        hfeat = patches @ self.w_patch + self.b_patch
        img_feat = hfeat.mean(axis=1) @ self.w_img_proj
        emb = jnp.take(self.token_emb, text, axis=0)
        txt_feat = emb.mean(axis=1) @ self.w_txt_proj
        img_n = img_feat / jnp.linalg.norm(img_feat, axis=-1, keepdims=True)
        txt_n = txt_feat / jnp.linalg.norm(txt_feat, axis=-1, keepdims=True)
        logits = self.logit_scale * img_n @ txt_n.T
        return 1.0 - logits / 100.0


# ---------------------------------------------------------------------------
if __name__ == "__main__":
    key = jax.random.PRNGKey(0)
    k_model, k_img, k_txt, k_big = jax.random.split(key, 4)

    clip_loss = CLIPLossPallas(k_model)

    # Standard path (image already at encoder resolution).
    image = jax.random.normal(k_img, (2, CHANNELS, IMG_SIZE, IMG_SIZE), jnp.float32)
    text = jax.random.randint(k_txt, (2, TXT_LEN), 0, VOCAB, dtype=jnp.int32)
    sim = jax.block_until_ready(clip_loss(image, text))

    # use_avg_pool path: 74 -> nearest-upsample x7 = 518 -> AvgPool(32) -> 16.
    image_big = jax.random.normal(k_big, (2, CHANNELS, 74, 74), jnp.float32)
    sim_pooled = jax.block_until_ready(clip_loss(image_big, text, use_avg_pool=True))

    # Shape / dtype / finiteness checks.
    assert sim.shape == (2, 2) and sim.dtype == jnp.float32
    assert sim_pooled.shape == (2, 2) and sim_pooled.dtype == jnp.float32
    assert bool(jnp.all(jnp.isfinite(sim))) and bool(jnp.all(jnp.isfinite(sim_pooled)))

    # Numerical check against the un-fused pure-JAX f32 reference.  This also
    # validates the bf16 cast of the folded weight/image on both paths against
    # the 1e-3 tolerance (per the review's correctness concern).
    ref = clip_loss.reference_forward(image, text)
    ref_pooled = clip_loss.reference_forward(image_big, text, use_avg_pool=True)
    assert bool(jnp.allclose(sim, ref, rtol=1e-3, atol=1e-3))
    assert bool(jnp.allclose(sim_pooled, ref_pooled, rtol=1e-3, atol=1e-3))

    print("KERNEL_OK")
</pallas_src>

<mosaic_0001>
module attributes {stable_mosaic.version = 11 : i64} {
  func.func @_clip_forward_kernel(%arg0: memref<2x768xbf16, #tpu.memory_space<vmem>>, %arg1: memref<16x768xbf16, #tpu.memory_space<vmem>>, %arg2: memref<1x16xf32, #tpu.memory_space<vmem>>, %arg3: memref<16xi32, #tpu.memory_space<smem>>, %arg4: memref<64x16xf32, #tpu.memory_space<vmem>>, %arg5: memref<8x128xf32, #tpu.memory_space<vmem>>) attributes {dimension_semantics = [], scalar_prefetch = 0 : i64, scratch_operands = 0 : i64, tpu.core_type = #tpu.core_type<tc>} {
    %c0 = arith.constant 0 : index
    %c0_0 = arith.constant 0 : index
    %0 = vector.load %arg1[%c0, %c0_0] : memref<16x768xbf16, #tpu.memory_space<vmem>>, vector<16x768xbf16>
    %c0_1 = arith.constant 0 : index
    %c0_2 = arith.constant 0 : index
    %1 = vector.load %arg0[%c0_1, %c0_2] : memref<2x768xbf16, #tpu.memory_space<vmem>>, vector<2x768xbf16>
    %cst = arith.constant dense<0.000000e+00> : vector<16x2xf32>
    %2 = tpu.matmul %0, %1, %cst {dimension_numbers = #tpu.dot_dimension_numbers<[1], [1], [0], [0], [0, 0, 1, 0], [], []>} : vector<16x768xbf16>, vector<2x768xbf16>, vector<16x2xf32> -> vector<16x2xf32>
    %3 = tpu.transpose %2, [1, 0] : vector<16x2xf32> -> vector<2x16xf32>
    %c0_3 = arith.constant 0 : index
    %c0_4 = arith.constant 0 : index
    %4 = vector.load %arg2[%c0_3, %c0_4] : memref<1x16xf32, #tpu.memory_space<vmem>>, vector<1x16xf32>
    %5 = vector.broadcast %4 : vector<1x16xf32> to vector<2x16xf32>
    %6 = arith.addf %3, %5 : vector<2x16xf32>
    %c0_5 = arith.constant 0 : index
    %7 = memref.load %arg3[%c0_5] : memref<16xi32, #tpu.memory_space<smem>>
    %8 = arith.index_cast %7 : i32 to index
    %c0_6 = arith.constant 0 : index
    %9 = vector.load %arg4[%8, %c0_6] : memref<64x16xf32, #tpu.memory_space<vmem>>, vector<1x16xf32>
    %c1 = arith.constant 1 : index
    %10 = memref.load %arg3[%c1] : memref<16xi32, #tpu.memory_space<smem>>
    %11 = arith.index_cast %10 : i32 to index
    %c0_7 = arith.constant 0 : index
    %12 = vector.load %arg4[%11, %c0_7] : memref<64x16xf32, #tpu.memory_space<vmem>>, vector<1x16xf32>
    %13 = arith.addf %9, %12 : vector<1x16xf32>
    %c2 = arith.constant 2 : index
    %14 = memref.load %arg3[%c2] : memref<16xi32, #tpu.memory_space<smem>>
    %15 = arith.index_cast %14 : i32 to index
    %c0_8 = arith.constant 0 : index
    %16 = vector.load %arg4[%15, %c0_8] : memref<64x16xf32, #tpu.memory_space<vmem>>, vector<1x16xf32>
    %17 = arith.addf %13, %16 : vector<1x16xf32>
    %c3 = arith.constant 3 : index
    %18 = memref.load %arg3[%c3] : memref<16xi32, #tpu.memory_space<smem>>
    %19 = arith.index_cast %18 : i32 to index
    %c0_9 = arith.constant 0 : index
    %20 = vector.load %arg4[%19, %c0_9] : memref<64x16xf32, #tpu.memory_space<vmem>>, vector<1x16xf32>
    %21 = arith.addf %17, %20 : vector<1x16xf32>
    %c4 = arith.constant 4 : index
    %22 = memref.load %arg3[%c4] : memref<16xi32, #tpu.memory_space<smem>>
    %23 = arith.index_cast %22 : i32 to index
    %c0_10 = arith.constant 0 : index
    %24 = vector.load %arg4[%23, %c0_10] : memref<64x16xf32, #tpu.memory_space<vmem>>, vector<1x16xf32>
    %25 = arith.addf %21, %24 : vector<1x16xf32>
    %c5 = arith.constant 5 : index
    %26 = memref.load %arg3[%c5] : memref<16xi32, #tpu.memory_space<smem>>
    %27 = arith.index_cast %26 : i32 to index
    %c0_11 = arith.constant 0 : index
    %28 = vector.load %arg4[%27, %c0_11] : memref<64x16xf32, #tpu.memory_space<vmem>>, vector<1x16xf32>
    %29 = arith.addf %25, %28 : vector<1x16xf32>
    %c6 = arith.constant 6 : index
    %30 = memref.load %arg3[%c6] : memref<16xi32, #tpu.memory_space<smem>>
    %31 = arith.index_cast %30 : i32 to index
    %c0_12 = arith.constant 0 : index
    %32 = vector.load %arg4[%31, %c0_12] : memref<64x16xf32, #tpu.memory_space<vmem>>, vector<1x16xf32>
    %33 = arith.addf %29, %32 : vector<1x16xf32>
    %c7 = arith.constant 7 : index
    %34 = memref.load %arg3[%c7] : memref<16xi32, #tpu.memory_space<smem>>
    %35 = arith.index_cast %34 : i32 to index
    %c0_13 = arith.constant 0 : index
    %36 = vector.load %arg4[%35, %c0_13] : memref<64x16xf32, #tpu.memory_space<vmem>>, vector<1x16xf32>
    %37 = arith.addf %33, %36 : vector<1x16xf32>
    %c8 = arith.constant 8 : index
    %38 = memref.load %arg3[%c8] : memref<16xi32, #tpu.memory_space<smem>>
    %39 = arith.index_cast %38 : i32 to index
    %c0_14 = arith.constant 0 : index
    %40 = vector.load %arg4[%39, %c0_14] : memref<64x16xf32, #tpu.memory_space<vmem>>, vector<1x16xf32>
    %c9 = arith.constant 9 : index
    %41 = memref.load %arg3[%c9] : memref<16xi32, #tpu.memory_space<smem>>
    %42 = arith.index_cast %41 : i32 to index
    %c0_15 = arith.constant 0 : index
    %43 = vector.load %arg4[%42, %c0_15] : memref<64x16xf32, #tpu.memory_space<vmem>>, vector<1x16xf32>
    %44 = arith.addf %40, %43 : vector<1x16xf32>
    %c10 = arith.constant 10 : index
    %45 = memref.load %arg3[%c10] : memref<16xi32, #tpu.memory_space<smem>>
    %46 = arith.index_cast %45 : i32 to index
    %c0_16 = arith.constant 0 : index
    %47 = vector.load %arg4[%46, %c0_16] : memref<64x16xf32, #tpu.memory_space<vmem>>, vector<1x16xf32>
    %48 = arith.addf %44, %47 : vector<1x16xf32>
    %c11 = arith.constant 11 : index
    %49 = memref.load %arg3[%c11] : memref<16xi32, #tpu.memory_space<smem>>
    %50 = arith.index_cast %49 : i32 to index
    %c0_17 = arith.constant 0 : index
    %51 = vector.load %arg4[%50, %c0_17] : memref<64x16xf32, #tpu.memory_space<vmem>>, vector<1x16xf32>
    %52 = arith.addf %48, %51 : vector<1x16xf32>
    %c12 = arith.constant 12 : index
    %53 = memref.load %arg3[%c12] : memref<16xi32, #tpu.memory_space<smem>>
    %54 = arith.index_cast %53 : i32 to index
    %c0_18 = arith.constant 0 : index
    %55 = vector.load %arg4[%54, %c0_18] : memref<64x16xf32, #tpu.memory_space<vmem>>, vector<1x16xf32>
    %56 = arith.addf %52, %55 : vector<1x16xf32>
    %c13 = arith.constant 13 : index
    %57 = memref.load %arg3[%c13] : memref<16xi32, #tpu.memory_space<smem>>
    %58 = arith.index_cast %57 : i32 to index
    %c0_19 = arith.constant 0 : index
    %59 = vector.load %arg4[%58, %c0_19] : memref<64x16xf32, #tpu.memory_space<vmem>>, vector<1x16xf32>
    %60 = arith.addf %56, %59 : vector<1x16xf32>
    %c14 = arith.constant 14 : index
    %61 = memref.load %arg3[%c14] : memref<16xi32, #tpu.memory_space<smem>>
    %62 = arith.index_cast %61 : i32 to index
    %c0_20 = arith.constant 0 : index
    %63 = vector.load %arg4[%62, %c0_20] : memref<64x16xf32, #tpu.memory_space<vmem>>, vector<1x16xf32>
    %64 = arith.addf %60, %63 : vector<1x16xf32>
    %c15 = arith.constant 15 : index
    %65 = memref.load %arg3[%c15] : memref<16xi32, #tpu.memory_space<smem>>
    %66 = arith.index_cast %65 : i32 to index
    %c0_21 = arith.constant 0 : index
    %67 = vector.load %arg4[%66, %c0_21] : memref<64x16xf32, #tpu.memory_space<vmem>>, vector<1x16xf32>
    %68 = arith.addf %64, %67 : vector<1x16xf32>
    %69 = tpu.concatenate %37, %68 in 0 : vector<1x16xf32>, vector<1x16xf32> -> vector<2x16xf32>
    %cst_22 = arith.constant 1.250000e-01 : f32
    %70 = vector.broadcast %cst_22 : f32 to vector<2x16xf32>
    %71 = arith.mulf %69, %70 : vector<2x16xf32>
    %72 = arith.mulf %6, %6 : vector<2x16xf32>
    %cst_23 = arith.constant dense<0.000000e+00> : vector<2xf32>
    %73 = vector.multi_reduction <add>, %72, %cst_23 [1] : vector<2x16xf32> to vector<2xf32>
    %74 = vector.shape_cast %73 : vector<2xf32> to vector<2x1xf32>
    %cst_24 = arith.constant 9.99999996E-13 : f32
    %75 = vector.broadcast %cst_24 : f32 to vector<2x1xf32>
    %76 = arith.addf %74, %75 : vector<2x1xf32>
    %77 = math.rsqrt %76 : vector<2x1xf32>
    %78 = vector.broadcast %77 : vector<2x1xf32> to vector<2x16xf32>
    %79 = arith.mulf %6, %78 : vector<2x16xf32>
    %80 = arith.mulf %71, %71 : vector<2x16xf32>
    %cst_25 = arith.constant dense<0.000000e+00> : vector<2xf32>
    %81 = vector.multi_reduction <add>, %80, %cst_25 [1] : vector<2x16xf32> to vector<2xf32>
    %82 = vector.shape_cast %81 : vector<2xf32> to vector<2x1xf32>
    %cst_26 = arith.constant 9.99999996E-13 : f32
    %83 = vector.broadcast %cst_26 : f32 to vector<2x1xf32>
    %84 = arith.addf %82, %83 : vector<2x1xf32>
    %85 = math.rsqrt %84 : vector<2x1xf32>
    %86 = vector.broadcast %85 : vector<2x1xf32> to vector<2x16xf32>
    %87 = arith.mulf %71, %86 : vector<2x16xf32>
    %cst_27 = arith.constant 0.142857149 : f32
    %88 = vector.broadcast %cst_27 : f32 to vector<2x16xf32>
    %89 = arith.mulf %87, %88 : vector<2x16xf32>
    %cst_28 = arith.constant 0.000000e+00 : f32
    %90 = vector.broadcast %cst_28 : f32 to vector<6x16xf32>
    %91 = tpu.concatenate %79, %90 in 0 : vector<2x16xf32>, vector<6x16xf32> -> vector<8x16xf32>
    %cst_29 = arith.constant 0.000000e+00 : f32
    %92 = vector.broadcast %cst_29 : f32 to vector<126x16xf32>
    %93 = tpu.concatenate %89, %92 in 0 : vector<2x16xf32>, vector<126x16xf32> -> vector<128x16xf32>
    %cst_30 = arith.constant dense<0.000000e+00> : vector<8x128xf32>
    %94 = tpu.matmul %91, %93, %cst_30 {dimension_numbers = #tpu.dot_dimension_numbers<[1], [1], [0], [0], [0, 0, 1, 0], [], []>} : vector<8x16xf32>, vector<128x16xf32>, vector<8x128xf32> -> vector<8x128xf32>
    %cst_31 = arith.constant 1.000000e+00 : f32
    %95 = vector.broadcast %cst_31 : f32 to vector<8x128xf32>
    %96 = arith.subf %95, %94 : vector<8x128xf32>
    %c0_32 = arith.constant 0 : index
    %c0_33 = arith.constant 0 : index
    %97 = vector.load %arg5[%c0_32, %c0_33] : memref<8x128xf32, #tpu.memory_space<vmem>>, vector<8x128xf32>
    tpu.vector_store %arg5[%c0_32, %c0_33], %96 {strides = array<i32>} : memref<8x128xf32, #tpu.memory_space<vmem>>, vector<8x128xf32>,
    return
  }
}

</mosaic_0001>

<bundles_post_ra>
// kernel: _clip_forward.1
= control target key start
LH: loop header
LB: loop body
LE: loop exit
PB: predicated region body
PF: predicated region fallthrough
CT: control target
= control target key end

     0   :  { %10 = vsyncpa [#allocation3], 0  ;;  %s667_s0 = inlined_call_operand.vmem [shape: bf16[2,768], index: 0, kind: input, shape index: {}]   ;;  %s668_s1 = inlined_call_operand.vmem [shape: bf16[16,768], index: 1, kind: input, shape index: {}]   ;;  %s669_s2 = inlined_call_operand.vmem [shape: f32[1,16], index: 2, kind: input, shape index: {}]   ;;  %s670_s3 = inlined_call_operand.vmem [shape: s32[16], index: 3, kind: input, shape index: {}]   ;;  %s671_s4 = inlined_call_operand.vmem [shape: f32[64,16], index: 4, kind: input, shape index: {}]   ;;  %s672_s5 = inlined_call_operand.vmem [shape: f32[8,128], index: 5, kind: output, shape index: {}]  }
   0x1   :  { %s23_s20 = sshll.u32 %s670_s3, 4  ;;  %s24_s20 = int_to_ptr.vmem [resolvable:$true] %s23_s20 }
   0x2   :  { %s533_s21 = scalar_lea.vmem %s24_s20, 16  ;;  %p538_p1 = scmp.lt.s32.totalorder %s24_s20, %s24_s20 }
   0x3   :  { %p534_p0 = scmp.ne.s32.totalorder %s24_s20, %s533_s21  ;;  %p539_p2 = scmp.lt.s32.totalorder %s533_s21, %s533_s21 }
   0x5   :  { %p540_p3 = por %p539_p2, %p538_p1 }
   0x7   :  { %p541_p4 = pnand %p540_p3, %p534_p0 }
   0x9   :  { %544 = shalt.err (!%p541_p4)
}
   0xa   :  { %s547_s22 = smov [#allocation2]  }
   0xb   :  { %26 = dma.vmem_to_smem %s24_s20, 16, %s547_s22, [#allocation3]  }
   0xc   :  { %545 = dma.done.wait [#allocation3], 16  }
   0xd   :  { %546 = vsyncadd [#allocation3], 4294967280 }
   0xe   :  { %32 = sfence }
   0xf   :  { %v76_v0 = vlaneseq  ;;  %v548_v1 = vmov 1966171168   ;;  %v522_v3 = vld [vmem:[%s668_s1 + $0xc] ss:$24 sps:$4 sm:$0xff]   ;;  %v523_v19 = vld [vmem:[%s668_s1] ss:$24 sps:$4 sm:$0xff]  }
  0x10   :  { %v74_v2 = vunpack.c.l.s4 %v548_v1  ;;  %v40_v4 = vld [vmem:[%s667_s0] sm:$0x3f]  ;;  %198 = vmatprep.mubr.bf16.mxu0 %v522_v3  ;;  %v528_v22 = vld [vmem:[%s668_s1 + $0x14] ss:$24 sps:$4 sm:$0xff]   ;;  %v526_v23 = vld [vmem:[%s668_s1 + $0x10] ss:$24 sps:$4 sm:$0xff]  }
  0x11   :  { %v77_v5 = vshrl.u32 %v76_v0, 7  ;;  %v525_v6 = vld [vmem:[%s668_s1 + $0x4] ss:$24 sps:$4 sm:$0xff]   ;;  %v72_v7 = vcombine.high %v40_v4, %v40_v4  ;;  %v520_v20 = vld [vmem:[%s668_s1 + $0x8] ss:$24 sps:$4 sm:$0xff]   ;;  %s288_s10 = sld [smem:[#allocation2]] }
  0x12   :  { %v75_v8 = vunpack.c.0.s8 %v74_v2  ;;  %157 = vmatprep.mubr.bf16.mxu1 %v525_v6  ;;  %s485_s11 = sld [smem:[#allocation2 + $0x1]]  ;;  %s486_s12 = sld [smem:[#allocation2 + $0x2]]  ;;  %vm353_vm0 = vcmask 1040384   ;;  %vm357_vm1 = vcmask 123904   ;;  %vm372_vm2 = vcmask 1041408  }
  0x13   :  { %s487_s13 = sld [smem:[#allocation2 + $0x3]]  ;;  %s488_s14 = sld [smem:[#allocation2 + $0x4]]  ;;  %vm375_vm3 = vcmask 130048   ;;  %vm550_vm4 = vmmov 0  }
  0x14   :  { %v78_v9 = vsub.s32 %v75_v8, %v77_v5  ;;  %s605_s15 = sld [smem:[#allocation2 + $0x5]]  ;;  %s492_s16 = sld [smem:[#allocation2 + $0x8]]  ;;  %v484_v5 = vld [vmem:[%s669_s2] ss:$0 sm:$0xff] }
  0x15   :  { %s493_s17 = sld [smem:[#allocation2 + $0x9]]  ;;  %s494_s18 = sld [smem:[#allocation2 + $0xa]] }
  0x16   :  { %v79_v10 = vrot.slane %v40_v4, %v78_v9  ;;  %v86_v11 = vrot.slane %v72_v7, %v78_v9  ;;  %s495_s19 = sld [smem:[#allocation2 + $0xb]]  ;;  %s490_s7 = sld [smem:[#allocation2 + $0x6]] }
  0x17   :  { %s289_s22 = scalar_lea.vmem %s671_s4, %s288_s10  ;;  %s622_s8 = sld [smem:[#allocation2 + $0x7]] }
  0x18   :  { %v87_v12 = vcombine.high %v79_v10, %v79_v10  ;;  %v95_v13 = vrot.slane %v79_v10, %v78_v9  ;;  %v88_v14 = vcombine.high %v86_v11, %v86_v11  ;;  %v102_v21 = vrot.slane %v86_v11, %v78_v9  ;;  %s292_s1 = scalar_lea.vmem %s671_s4, %s485_s11  ;;  %v290_v24 = vld [vmem:[%s289_s22] sm:$0x1]  ;;  %s296_s26 = scalar_lea.vmem %s671_s4, %s486_s12 }
  0x19   :  { %v293_v25 = vld [vmem:[%s292_s1] sm:$0x1]  ;;  %s300_s28 = scalar_lea.vmem %s671_s4, %s487_s13  ;;  %s304_s6 = scalar_lea.vmem %s671_s4, %s488_s14 }
  0x1a   :  { %v109_v15 = vrot.slane %v87_v12, %v78_v9  ;;  %v117_v16 = vcombine.high %v95_v13, %v95_v13  ;;  %v116_v18 = vrot.slane %v88_v14, %v78_v9  ;;  %v294_v26 = vadd.f32 %v293_v25, %v290_v24  ;;  %v297_v27 = vld [vmem:[%s296_s26] sm:$0x1]  ;;  %s320_s11 = scalar_lea.vmem %s671_s4, %s492_s16  ;;  %s308_s16 = scalar_lea.vmem %s671_s4, %s605_s15 }
  0x1b   :  { %v301_v28 = vld [vmem:[%s300_s28] sm:$0x1]  ;;  %s323_s13 = scalar_lea.vmem %s671_s4, %s493_s17  ;;  %s327_s14 = scalar_lea.vmem %s671_s4, %s494_s18  ;;  %v549_v14 = vmov 0.0  }
  0x1c   :  { %v118_v17 = vcombine.high %v109_v15, %v109_v15  ;;  %125 = vmatprep.subr.bf16.mxu1 %v109_v15  ;;  %v298_v29 = vadd.f32 %v297_v27, %v294_v26  ;;  %v305_v30 = vld [vmem:[%s304_s6] sm:$0x1]  ;;  %s331_s1 = scalar_lea.vmem %s671_s4, %s495_s19  ;;  %s496_s26 = sld [smem:[#allocation2 + $0xc]] }
  0x1d   :  { %126 = vmatpush1.bf16.xpose.msra.mxu1 %v95_v13  ;;  %v321_v31 = vld [vmem:[%s320_s11] sm:$0x1]  ;;  %s497_s17 = sld [smem:[#allocation2 + $0xd]]  ;;  %s498_s27 = sld [smem:[#allocation2 + $0xe]] }
  0x1e   :  { %166 = vmatprep.subr.bf16.mxu0 %v118_v17  ;;  %v324_v32 = vld [vmem:[%s323_s13] sm:$0x1]  ;;  %v302_v33 = vadd.f32 %v301_v28, %v298_v29  ;;  %s499_s0 = sld [smem:[#allocation2 + $0xf]]  ;;  %s312_s19 = scalar_lea.vmem %s671_s4, %s490_s7  ;;  %504 = vmatprep.subr.mxu1 %v549_v14 }
  0x1f   :  { %167 = vmatpush1.bf16.xpose.msra.mxu0 %v117_v16  ;;  %v325_v34 = vadd.f32 %v324_v32, %v321_v31  ;;  %v328_v35 = vld [vmem:[%s327_s14] sm:$0x1]  ;;  %s316_s7 = scalar_lea.vmem %s671_s4, %s622_s8 }
  0x20   :  { %207 = vmatprep.subr.bf16.mxu0 %v116_v18  ;;  %v332_v36 = vld [vmem:[%s331_s1] sm:$0x1]  ;;  %v306_v37 = vadd.f32 %v305_v30, %v302_v33 }
  0x21   :  { %v329_v38 = vadd.f32 %v328_v35, %v325_v34  ;;  %v309_v39 = vld [vmem:[%s308_s16] sm:$0x1] }
  0x22   :  { %v310_v41 = vadd.f32 %v309_v39, %v306_v37  ;;  %s335_s15 = scalar_lea.vmem %s671_s4, %s496_s26  ;;  %v313_v42 = vld [vmem:[%s312_s19] sm:$0x1] }
  0x23   :  { %v333_v40 = vadd.f32 %v332_v36, %v329_v38  ;;  %v336_v43 = vld [vmem:[%s335_s15] sm:$0x1]  ;;  %s339_s10 = scalar_lea.vmem %s671_s4, %s497_s17  ;;  %s343_s20 = scalar_lea.vmem %s671_s4, %s498_s27 }
  0x24   :  { %158 = vmatmul.mubr.bf16.vlgmr.msra.gmra.mrb[0].mxu1 %v523_v19  ;;  %v340_v45 = vld [vmem:[%s339_s10] sm:$0x1]  ;;  %s347_s23 = scalar_lea.vmem %s671_s4, %s499_s0  ;;  %v314_v47 = vadd.f32 %v313_v42, %v310_v41 }
  0x25   :  { %v337_v44 = vadd.f32 %v336_v43, %v333_v40  ;;  %v344_v46 = vld [vmem:[%s343_s20] sm:$0x1]  ;;  %506 = vmatprep.mubr.msk.f32.mxu1 %vm550_vm4, %v549_v14 }
  0x26   :  { %199 = vmatmul.mubr.bf16.vlgmr.msra.gmra.mrb[0].mxu0 %v520_v20  ;;  %v317_v49 = vld [vmem:[%s316_s7] sm:$0x1] }
  0x27   :  { %208 = vmatpush1.bf16.xpose.msra.mxu0 %v102_v21  ;;  %239 = vmatprep.mubr.bf16.mxu0 %v528_v22  ;;  %v341_v48 = vadd.f32 %v340_v45, %v337_v44  ;;  %v348_v50 = vld [vmem:[%s347_s23] sm:$0x1]  ;;  %v318_v52 = vadd.f32 %v317_v49, %v314_v47 }
  0x29   :  { %v345_v51 = vadd.f32 %v344_v46, %v341_v48 }
  0x2b   :  { %v349_v53 = vadd.f32 %v348_v50, %v345_v51 }
  0x2d   :  { %v351_v54 = vrot.slane %v349_v53, 7 }
  0x2f   :  { %v354_v55 = vsel %vm353_vm0, %v318_v52, %v351_v54 }
  0x30   :  { %v355_v56 = vmul.f32 0.125, %v354_v55 }
  0x32   :  { %240 = vmatmul.mubr.bf16.vlgmr.msra.gmra.mrb[0].mxu0 %v526_v23  ;;  %v364_v57 = vmul.f32 %v355_v56, %v355_v56 }
  0x34   :  { %v365_v58 = vsel %vm357_vm1, %v364_v57, 0.0 }
  0x35   :  { %366 = vadd.xlane.f32.xlu1 %v365_v58 }
  0xc2   :  { %v367_v8 = vpop.xlane.xlu1 %366 }
  0xc3   :  { %v368_v11 = vadd.f32 1e-12, %v367_v8 }
  0xc5   :  { %529 = vrsqrt.f32 %v368_v11 }
  0xcf   :  { %v530_v12 = vpop.eup %529 }
  0xd0   :  { %v370_v13 = vmul.f32 %v530_v12, %v355_v56 }
  0xd2   :  { %v371_v15 = vmul.f32 0.14285715, %v370_v13 }
  0xd4   :  { %v374_v16 = vsel %vm372_vm2, %v371_v15, 0.0 }
  0xd5   :  { %505 = vmatpush3.xpose.msk.msra.mxu1 %vm375_vm3, %v374_v16 }
  0xf7   :  { %v159_v59 = vpop.f32.mrb[0].mxu1 }
  0xf8   :  { %v161_v60 = vpop.f32.mrb[1].mxu1 }
  0xf9   :  { %v162_v61 = vpop.f32.mrb[2].mxu1 }
  0xfa   :  { %v164_v62 = vpop.f32.mrb[3].mxu1 }
 0x105   :  { %v241_v63 = vpop.f32.mrb[0].mxu0 }
 0x106   :  { %v243_v0 = vpop.f32.mrb[1].mxu0  ;;  %v509_v1 = vadd.f32 %v241_v63, %v159_v59 }
 0x107   :  { %v244_v2 = vpop.f32.mrb[2].mxu0 }
 0x108   :  { %v510_v3 = vadd.f32 %v244_v2, %v162_v61  ;;  %v246_v4 = vpop.f32.mrb[3].mxu0  ;;  %248 = vxpose.xlu0.b32.start [1/2] (short) (narrow) %v509_v1, 8 }
 0x10c   :  { %249 = vxpose.xlu0.b32.end [2/2] (short) (narrow) %v510_v3, 8 }
 0x188   :  { %v264_v6 = vpop.trf.xlu0 }
 0x189   :  { %v287_v7 = vadd.f32 %v484_v5, %v264_v6 }
 0x18b   :  { %v356_v9 = vmul.f32 %v287_v7, %v287_v7 }
 0x18d   :  { %v358_v10 = vsel %vm357_vm1, %v356_v9, 0.0 }
 0x18e   :  { %359 = vadd.xlane.f32.xlu1 %v358_v10 }
 0x21b   :  { %v360_v17 = vpop.xlane.xlu1 %359 }
 0x21c   :  { %v361_v18 = vadd.f32 1e-12, %v360_v17 }
 0x21e   :  { %531 = vrsqrt.f32 %v361_v18 }
 0x228   :  { %v532_v19 = vpop.eup %531 }
 0x229   :  { %v363_v20 = vmul.f32 %v532_v19, %v287_v7 }
 0x22b   :  { %v373_v21 = vsel %vm372_vm2, %v363_v20, 0.0 }
 0x22c   :  { %507 = vmatmul.mubr.msk.f32.vlgmr.msra.gmra.mrb[4].mxu1 %vm375_vm3, %v373_v21 }
 0x2ff   :  { %v451_v22 = vpop.f32.mrb[4].mxu1 }
 0x300   :  { %v455_v23 = vsub.f32 1.0, %v451_v22  ;;  %v508_v24 = vpop.f32.mrb[5].mxu1 }
 0x302   :  { %456 = vst [vmem:[%s672_s5] sm:$0xff] %v455_v23 }
 0x303   :  { %461 = vsyncpa [#allocation3], 1 }

</bundles_post_ra>
